<compile_context>
chip_gen: v7x
topology: tpu7x:2x2x1
jax: 0.10.0
libtpu: 0.0.40
codegen_flags: <defaults>
</compile_context>

<pallas_src>
import math

import jax
import jax.numpy as jnp
from jax.experimental import pallas as pl
from jax.experimental.pallas import tpu as pltpu


def _divisors(n):
    ds = []
    i = 1
    while i * i <= n:
        if n % i == 0:
            ds.append(i)
            j = n // i
            if j != i:
                ds.append(j)
        i += 1
    return sorted(ds)


def _pick_tile_rows(R, rows_period, max_rows):
    """Largest legal row tile TR: TR | R, TR % rows_period == 0,
    and (TR % 8 == 0 or TR == R); prefer the biggest one under the budget."""
    cands = [d for d in _divisors(R)
             if d % rows_period == 0 and (d % 8 == 0 or d == R)]
    if not cands:            # defensive; R itself always qualifies
        return R
    under = [d for d in cands if d <= max_rows]
    if under:
        return max(under)
    # Nothing fits the budget: take the SMALLEST legal tile (not the whole extent)
    # to avoid a silent VMEM blowup.
    # TODO(synk): a ragged cdiv grid with a masked last tile would remove the
    # remaining corner case where R has no small divisors (e.g. large prime R).
    return min(cands)


def _make_kernel(*, TR, PR, lanes, real_weight, imag_weight):
    def kernel(sc_ref, sp_ref, pred_ref, target_ref, out_ref, acc_ref):
        c = pl.program_id(0)          # channel (real / imag)
        b = pl.program_id(1)          # batch
        t = pl.program_id(2)          # row tile
        nb = pl.num_programs(1)
        nt = pl.num_programs(2)

        @pl.when((b == 0) & (t == 0))
        def _init():
            acc_ref[...] = jnp.zeros_like(acc_ref)

        diff = (pred_ref[...].astype(jnp.float32)
                - target_ref[...].astype(jnp.float32))
        sc = sc_ref[...]              # central scale (c_w / n_central or 0)
        sp = sp_ref[...]              # periphery scale (p_w / n_periph or 0)

        if TR == PR:
            # Tile-sized slab: plain element-wise multiply-add into the slab acc.
            acc_ref[...] += sc * (diff * diff) + sp * jnp.abs(diff)
        else:
            # Hierarchical: per-element weighted contribution, then a leading-axis
            # chunk-sum (per-lane vreg adds only) into the small (PR, lanes) acc.
            d3 = diff.reshape(TR // PR, PR, lanes)
            contrib = sc[None, :, :] * (d3 * d3) + sp[None, :, :] * jnp.abs(d3)
            acc_ref[...] += jnp.sum(contrib, axis=0)

        @pl.when((b == nb - 1) & (t == nt - 1))
        def _finalize():
            # NOTE: grid dim 0 is the channel axis; keep in sync with index_maps.
            ch_w = jnp.where(c == 0, jnp.float32(real_weight),
                             jnp.float32(imag_weight))
            total = ch_w * jnp.sum(acc_ref[...])   # single small XLU reduction
            out_ref[...] = jnp.zeros_like(out_ref) + total  # lane-dense store

    return kernel


def combined_kspace_rowwise_mse_loss(pred, target, *, central_fraction=0.25,
                                     real_weight=1.0, imag_weight=1.0,
                                     central_weight=1.0, periphery_weight=1.0,
                                     tile_bytes=None, vmem_limit_bytes=None):
    assert pred.shape == target.shape
    B, C, H, W = pred.shape
    assert C == 2, "expected [B, 2, H, W] (real & imag channels)"

    central_width = int(W * central_fraction)
    assert 0 < central_width < W, "central_fraction leaves an empty region"
    start = (W - central_width) // 2
    end = start + central_width
    n_central = B * H * central_width
    n_periph = B * H * (W - central_width)

    # ---- chip-aware + dtype-aware budgets --------------------------------
    try:
        vmem_cap = int(getattr(pltpu.get_tpu_info(), "vmem_capacity_bytes",
                               64 * 1024 * 1024))
    except Exception:
        vmem_cap = 64 * 1024 * 1024
    big_vmem = vmem_cap >= 96 * 1024 * 1024           # v5e / v6e: 128 MiB per TC
    if tile_bytes is None:
        tile_bytes = (4 if big_vmem else 2) * 1024 * 1024   # per input, per buffer
    if vmem_limit_bytes is None:
        vmem_limit_bytes = (64 if big_vmem else 40) * 1024 * 1024

    itemsize = jnp.dtype(pred.dtype).itemsize
    max_tile_elems = max(8 * 128, tile_bytes // itemsize)    # equal bytes per DMA

    # ---- lane-dense flattened layout --------------------------------------
    lanes = 128
    if (H * W) % lanes != 0:
        # Rare fallback: pad every k-space row to a multiple of 128 lanes; padded
        # columns get zero scale so they contribute nothing to either sum.
        W_pad = ((W + lanes - 1) // lanes) * lanes
        pad = ((0, 0), (0, 0), (0, 0), (0, W_pad - W))
        pred = jnp.pad(pred, pad)
        target = jnp.pad(target, pad)
        W_eff = W_pad
    else:
        W_eff = W

    R = (H * W_eff) // lanes
    g = math.gcd(W_eff, lanes)
    rows_period = W_eff // g          # column pattern repeats every this many rows
    max_rows = max(1, max_tile_elems // lanes)
    TR = _pick_tile_rows(R, rows_period, max_rows)
    n_t = R // TR

    # Scale-slab row period: a multiple of 8 sublanes and of the column period.
    PR = (rows_period * 8) // math.gcd(rows_period, 8)
    if TR % PR != 0:
        PR = TR                       # tile-sized slab (TR*lanes % W_eff == 0 holds)

    pred_r = pred.reshape(B, 2, R, lanes)
    target_r = target.reshape(B, 2, R, lanes)

    # Precomputed per-lane scale slabs: no iota / %W / compare / select per step.
    col = (jnp.arange(PR * lanes, dtype=jnp.int32) % W_eff).reshape(PR, lanes)
    is_central = (col >= start) & (col < end)
    is_valid = col < W                # excludes padded columns in the fallback path
    scale_c = jnp.where(is_central,
                        jnp.float32(float(central_weight) / float(n_central)),
                        jnp.float32(0.0)).astype(jnp.float32)
    scale_p = jnp.where(jnp.logical_and(~is_central, is_valid),
                        jnp.float32(float(periphery_weight) / float(n_periph)),
                        jnp.float32(0.0)).astype(jnp.float32)

    kernel = _make_kernel(TR=TR, PR=PR, lanes=lanes,
                          real_weight=float(real_weight),
                          imag_weight=float(imag_weight))

    scale_spec = pl.BlockSpec((PR, lanes), lambda c, b, t: (0, 0))   # resident
    in_spec = pl.BlockSpec((None, None, TR, lanes), lambda c, b, t: (b, c, t, 0))
    out_spec = pl.BlockSpec((None, 8, 128), lambda c, b, t: (c, 0, 0))

    # Rough footprint estimate; never request more than ~90% of physical VMEM.
    need = (2 * 2 * TR * lanes * itemsize         # 2 inputs x double buffer
            + 2 * 2 * PR * lanes * 4              # 2 scale slabs x double buffer
            + PR * lanes * 4                      # accumulator scratch
            + 2 * 8 * 128 * 4                     # output block
            + 6 * TR * lanes * 4)                 # element-wise temporaries headroom
    vmem_limit_bytes = int(min(max(vmem_limit_bytes, need), int(vmem_cap * 0.9)))

    in_bytes = pred_r.size * itemsize + target_r.size * itemsize
    cost = pl.CostEstimate(flops=6 * pred_r.size, transcendentals=0,
                           bytes_accessed=in_bytes + 2 * PR * lanes * 4
                           + 2 * 8 * 128 * 4)

    partial = pl.pallas_call(
        kernel,
        out_shape=jax.ShapeDtypeStruct((2, 8, 128), jnp.float32),
        grid_spec=pltpu.PrefetchScalarGridSpec(
            num_scalar_prefetch=0,
            grid=(2, B, n_t),
            in_specs=[scale_spec, scale_spec, in_spec, in_spec],
            out_specs=out_spec,
            scratch_shapes=[pltpu.VMEM((PR, lanes), jnp.float32)],
        ),
        compiler_params=pltpu.CompilerParams(
            dimension_semantics=("parallel", "arbitrary", "arbitrary"),
            vmem_limit_bytes=vmem_limit_bytes,
        ),
        cost_estimate=cost,
    )(scale_c, scale_p, pred_r, target_r)

    # Per-channel weighted partials (one per TensorCore on v7x) summed here.
    return partial[0, 0, 0] + partial[1, 0, 0]


def _reference(pred, target, *, central_fraction=0.25, real_weight=1.0,
               imag_weight=1.0, central_weight=1.0, periphery_weight=1.0):
    # Pure-JAX reference matching the PyTorch module exactly.
    B, _, H, W = pred.shape
    cw = int(W * central_fraction)
    start = (W - cw) // 2
    end = start + cw

    def rowwise(p, t):
        d = p - t
        central = jnp.mean(d[:, :, start:end] ** 2)
        periph = jnp.mean(jnp.abs(
            jnp.concatenate([d[:, :, :start], d[:, :, end:]], axis=-1)))
        return central, periph

    rc, rp = rowwise(pred[:, 0], target[:, 0])
    ic, ip = rowwise(pred[:, 1], target[:, 1])
    real_loss = central_weight * rc + periphery_weight * rp
    imag_loss = central_weight * ic + periphery_weight * ip
    return real_weight * real_loss + imag_weight * imag_loss


if __name__ == "__main__":
    key = jax.random.PRNGKey(0)
    k1, k2, k3, k4 = jax.random.split(key, 4)

    # Test 1: [B=2, 2, H=16, W=16], default weights (lane-dense flattened path).
    B, H, W = 2, 16, 16
    pred = jax.random.normal(k1, (B, 2, H, W), dtype=jnp.float32)
    target = jax.random.normal(k2, (B, 2, H, W), dtype=jnp.float32)
    loss = jax.block_until_ready(combined_kspace_rowwise_mse_loss(pred, target))
    ref = _reference(pred, target)
    assert jnp.allclose(loss, ref, rtol=1e-5, atol=1e-5), (loss, ref)

    # Test 2: non-trivial weights on the same inputs.
    kwargs = dict(central_fraction=0.25, real_weight=1.3, imag_weight=0.7,
                  central_weight=2.0, periphery_weight=0.5)
    loss2 = jax.block_until_ready(
        combined_kspace_rowwise_mse_loss(pred, target, **kwargs))
    ref2 = _reference(pred, target, **kwargs)
    assert jnp.allclose(loss2, ref2, rtol=1e-5, atol=1e-5), (loss2, ref2)

    # Test 3: H*W not a multiple of 128 -> padded lane-dense fallback.
    B3, H3, W3 = 1, 12, 20
    pred3 = jax.random.normal(k3, (B3, 2, H3, W3), dtype=jnp.float32)
    target3 = jax.random.normal(k4, (B3, 2, H3, W3), dtype=jnp.float32)
    loss3 = jax.block_until_ready(combined_kspace_rowwise_mse_loss(pred3, target3))
    ref3 = _reference(pred3, target3)
    assert jnp.allclose(loss3, ref3, rtol=1e-5, atol=1e-5), (loss3, ref3)

    print("KERNEL_OK")
</pallas_src>

<mosaic_0001>
module attributes {stable_mosaic.version = 11 : i64} {
  func.func @kernel(%arg0: i32, %arg1: i32, %arg2: i32, %arg3: memref<2x128xf32, #tpu.memory_space<vmem>>, %arg4: memref<2x128xf32, #tpu.memory_space<vmem>>, %arg5: memref<1x1x2x128xf32, #tpu.memory_space<vmem>>, %arg6: memref<1x1x2x128xf32, #tpu.memory_space<vmem>>, %arg7: memref<1x8x128xf32, #tpu.memory_space<vmem>>, %arg8: memref<2x128xf32, #tpu.memory_space<vmem>>) attributes {dimension_semantics = [#tpu.dimension_semantics<parallel>, #tpu.dimension_semantics<arbitrary>, #tpu.dimension_semantics<arbitrary>], iteration_bounds = array<i64: 2, 2, 1>, scalar_prefetch = 0 : i64, scratch_operands = 1 : i64, tpu.core_type = #tpu.core_type<tc>, window_params = [{pipeline_mode = #tpu.pipeline_mode<synchronous>, transform_indices = @transform_0, window_bounds = array<i64: 2, 128>}, {pipeline_mode = #tpu.pipeline_mode<synchronous>, transform_indices = @transform_1, window_bounds = array<i64: 2, 128>}, {transform_indices = @transform_2, window_bounds = array<i64: 1, 1, 2, 128>}, {transform_indices = @transform_3, window_bounds = array<i64: 1, 1, 2, 128>}, {transform_indices = @transform_4, window_bounds = array<i64: 1, 8, 128>}]} {
    %c0_i32 = arith.constant 0 : i32
    %0 = arith.cmpi eq, %arg1, %c0_i32 : i32
    %c0_i32_0 = arith.constant 0 : i32
    %1 = arith.cmpi eq, %arg2, %c0_i32_0 : i32
    %2 = arith.andi %0, %1 : i1
    %3 = arith.extui %2 : i1 to i32
    %c0_i32_1 = arith.constant 0 : i32
    %4 = arith.cmpi ne, %3, %c0_i32_1 : i32
    scf.if %4 {
      %cst = arith.constant 0.000000e+00 : f32
      %25 = vector.broadcast %cst : f32 to vector<2x128xf32>
      %c0_19 = arith.constant 0 : index
      %c0_20 = arith.constant 0 : index
      %26 = vector.load %arg8[%c0_19, %c0_20] : memref<2x128xf32, #tpu.memory_space<vmem>>, vector<2x128xf32>
      tpu.vector_store %arg8[%c0_19, %c0_20], %25 {strides = array<i32>} : memref<2x128xf32, #tpu.memory_space<vmem>>, vector<2x128xf32>,
    } else {
    }
    %c0 = arith.constant 0 : index
    %c0_2 = arith.constant 0 : index
    %c0_3 = arith.constant 0 : index
    %c0_4 = arith.constant 0 : index
    %5 = vector.load %arg5[%c0, %c0_2, %c0_3, %c0_4] : memref<1x1x2x128xf32, #tpu.memory_space<vmem>>, vector<1x1x2x128xf32>
    %6 = vector.shape_cast %5 : vector<1x1x2x128xf32> to vector<2x128xf32>
    %c0_5 = arith.constant 0 : index
    %c0_6 = arith.constant 0 : index
    %c0_7 = arith.constant 0 : index
    %c0_8 = arith.constant 0 : index
    %7 = vector.load %arg6[%c0_5, %c0_6, %c0_7, %c0_8] : memref<1x1x2x128xf32, #tpu.memory_space<vmem>>, vector<1x1x2x128xf32>
    %8 = vector.shape_cast %7 : vector<1x1x2x128xf32> to vector<2x128xf32>
    %9 = arith.subf %6, %8 : vector<2x128xf32>
    %c0_9 = arith.constant 0 : index
    %c0_10 = arith.constant 0 : index
    %10 = vector.load %arg3[%c0_9, %c0_10] : memref<2x128xf32, #tpu.memory_space<vmem>>, vector<2x128xf32>
    %c0_11 = arith.constant 0 : index
    %c0_12 = arith.constant 0 : index
    %11 = vector.load %arg4[%c0_11, %c0_12] : memref<2x128xf32, #tpu.memory_space<vmem>>, vector<2x128xf32>
    %c0_13 = arith.constant 0 : index
    %c0_14 = arith.constant 0 : index
    %12 = vector.load %arg8[%c0_13, %c0_14] : memref<2x128xf32, #tpu.memory_space<vmem>>, vector<2x128xf32>
    %13 = arith.mulf %9, %9 : vector<2x128xf32>
    %14 = arith.mulf %10, %13 : vector<2x128xf32>
    %15 = math.absf %9 : vector<2x128xf32>
    %16 = arith.mulf %11, %15 : vector<2x128xf32>
    %17 = arith.addf %14, %16 : vector<2x128xf32>
    %18 = arith.addf %12, %17 : vector<2x128xf32>
    %c0_15 = arith.constant 0 : index
    %c0_16 = arith.constant 0 : index
    %19 = vector.load %arg8[%c0_15, %c0_16] : memref<2x128xf32, #tpu.memory_space<vmem>>, vector<2x128xf32>
    tpu.vector_store %arg8[%c0_15, %c0_16], %18 {strides = array<i32>} : memref<2x128xf32, #tpu.memory_space<vmem>>, vector<2x128xf32>,
    %c1_i32 = arith.constant 1 : i32
    %20 = arith.cmpi eq, %arg1, %c1_i32 : i32
    %c0_i32_17 = arith.constant 0 : i32
    %21 = arith.cmpi eq, %arg2, %c0_i32_17 : i32
    %22 = arith.andi %20, %21 : i1
    %23 = arith.extui %22 : i1 to i32
    %c0_i32_18 = arith.constant 0 : i32
    %24 = arith.cmpi ne, %23, %c0_i32_18 : i32
    scf.if %24 {
      %c0_i32_19 = arith.constant 0 : i32
      %25 = arith.cmpi eq, %arg0, %c0_i32_19 : i32
      %cst = arith.constant 1.000000e+00 : f32
      %cst_20 = arith.constant 1.000000e+00 : f32
      %26 = arith.select %25, %cst, %cst_20 : f32
      %c0_21 = arith.constant 0 : index
      %c0_22 = arith.constant 0 : index
      %27 = vector.load %arg8[%c0_21, %c0_22] : memref<2x128xf32, #tpu.memory_space<vmem>>, vector<2x128xf32>
      %28 = vector.shape_cast %27 : vector<2x128xf32> to vector<1x2x128xf32>
      %cst_23 = arith.constant dense<0.000000e+00> : vector<1xf32>
      %29 = vector.multi_reduction <add>, %28, %cst_23 [1, 2] : vector<1x2x128xf32> to vector<1xf32>
      %30 = vector.shape_cast %29 : vector<1xf32> to vector<1x1x1xf32>
      %31 = vector.extract %30[0, 0, 0] : f32 from vector<1x1x1xf32>
      %32 = arith.mulf %26, %31 : f32
      %cst_24 = arith.constant 0.000000e+00 : f32
      %33 = vector.broadcast %cst_24 : f32 to vector<8x128xf32>
      %34 = vector.broadcast %32 : f32 to vector<8x128xf32>
      %35 = arith.addf %33, %34 : vector<8x128xf32>
      %c0_25 = arith.constant 0 : index
      %c0_26 = arith.constant 0 : index
      %c0_27 = arith.constant 0 : index
      %36 = vector.load %arg7[%c0_25, %c0_26, %c0_27] : memref<1x8x128xf32, #tpu.memory_space<vmem>>, vector<1x8x128xf32>
      %37 = vector.shape_cast %36 : vector<1x8x128xf32> to vector<8x128xf32>
      %38 = vector.shape_cast %35 : vector<8x128xf32> to vector<1x8x128xf32>
      tpu.vector_store %arg7[%c0_25, %c0_26, %c0_27], %38 {strides = array<i32>} : memref<1x8x128xf32, #tpu.memory_space<vmem>>, vector<1x8x128xf32>,
    } else {
    }
    return
  }
  func.func @transform_0(%arg0: i32, %arg1: i32, %arg2: i32) -> (i32, i32) {
    %c0_i32 = arith.constant 0 : i32
    %c0_i32_0 = arith.constant 0 : i32
    %c0_i32_1 = arith.constant 0 : i32
    return %c0_i32, %c0_i32_0 : i32, i32
  }
  func.func @transform_1(%arg0: i32, %arg1: i32, %arg2: i32) -> (i32, i32) {
    %c0_i32 = arith.constant 0 : i32
    %c0_i32_0 = arith.constant 0 : i32
    %c0_i32_1 = arith.constant 0 : i32
    return %c0_i32, %c0_i32_0 : i32, i32
  }
  func.func @transform_2(%arg0: i32, %arg1: i32, %arg2: i32) -> (i32, i32, i32, i32) {
    %c0_i32 = arith.constant 0 : i32
    %c0_i32_0 = arith.constant 0 : i32
    return %arg1, %arg0, %arg2, %c0_i32 : i32, i32, i32, i32
  }
  func.func @transform_3(%arg0: i32, %arg1: i32, %arg2: i32) -> (i32, i32, i32, i32) {
    %c0_i32 = arith.constant 0 : i32
    %c0_i32_0 = arith.constant 0 : i32
    return %arg1, %arg0, %arg2, %c0_i32 : i32, i32, i32, i32
  }
  func.func @transform_4(%arg0: i32, %arg1: i32, %arg2: i32) -> (i32, i32, i32) {
    %c0_i32 = arith.constant 0 : i32
    %c0_i32_0 = arith.constant 0 : i32
    %c0_i32_1 = arith.constant 0 : i32
    return %arg0, %c0_i32, %c0_i32_0 : i32, i32, i32
  }
}

</mosaic_0001>

<bundles_post_ra>
// kernel: tpu_custom_call.1
= control target key start
LH: loop header
LB: loop body
LE: loop exit
PB: predicated region body
PF: predicated region fallthrough
CT: control target
= control target key end

     0   :  { %s1096_s0 = inlined_call_operand.hbm [shape: f32[2,128], index: 0, kind: input, shape index: {}]   ;;  %s1097_s1 = inlined_call_operand.vmem [shape: f32[2,128], index: 1, kind: input, shape index: {}]   ;;  %s1098_s2 = inlined_call_operand.hbm [shape: f32[2,2,2,128], index: 2, kind: input, shape index: {}]   ;;  %s1099_s3 = inlined_call_operand.vmem [shape: f32[2,2,2,128], index: 3, kind: input, shape index: {}]   ;;  %s1100_s4 = inlined_call_operand.hbm [shape: f32[2,8,128], index: 4, kind: output, shape index: {}]  }
   0x1   :  { %1113 = sst [smem:[#allocation17_spill]] %s1096_s0 }
   0x2   :  { %1114 = sst [smem:[#allocation18_spill]] %s1097_s1 }
   0x3   :  { %1115 = sst [smem:[#allocation19_spill]] %s1099_s3 }
   0x4   :  { %1116 = sst [smem:[#allocation20_spill]] %s1100_s4 }
   0x5   :  { %9 = vsyncpa [#allocation4], 0 }
   0x6   :  { %10 = vsyncpa [#allocation7], 0 }
   0x7   :  { %12 = vsyncpa [#allocation7 + $0x1], 0 }
   0x8   :  { %13 = vsyncpa [#allocation5], 0 }
   0x9   :  { %15 = vsyncpa [#allocation5 + $0x1], 0  ;;  %s821_s15 = smov 0   ;;  %s823_s16 = smov 0  }
   0xa   :  { %s825_s17 = smov 0   ;;  %s827_s18 = smov 0  }
   0xb   :  { %s829_s19 = smov 0   ;;  %s831_s20 = smov 0  }
   0xc   :  { %s833_s21 = smov 0   ;;  %s835_s22 = smov 0  }
   0xd   :  { %s837_s23 = smov 0   ;;  %s839_s24 = smov 0  }
   0xe   :  { %s841_s25 = smov 0  }
   0xf LB: > { %1117 = sst [smem:[#allocation12_spill]] %s750_s15  ;;  %s468_s26 = sadd.s32 4294967295, %s790_s25   ;;  %s790_s25 = sphi %s841_s25, %s21_s25   ;;  %s786_s24 = sphi %s839_s24, %s1155_s24   ;;  %s782_s23 = sphi %s837_s23, %s1154_s23   ;;  %s778_s22 = sphi %s835_s22, %s1153_s22   ;;  %s774_s21 = sphi %s833_s21, %s1152_s21   ;;  %s770_s20 = sphi %s831_s20, %s1151_s20   ;;  %s766_s19 = sphi %s829_s19, %s1150_s19   ;;  %s762_s18 = sphi %s827_s18, %s1149_s18   ;;  %s758_s17 = sphi %s825_s17, %s1148_s17   ;;  %s754_s16 = sphi %s823_s16, %s1147_s16   ;;  %s750_s15 = sphi %s821_s15, %s1146_s15  }
  0x10   : > { %1118 = sst [smem:[#allocation13_spill]] %s778_s22  ;;  %s469_s27 = sadd.s32 4294967294, %s790_s25  }
  0x11   : > { %p106_p0 = scmp.ne.s32.totalorder %s766_s19, %s762_s18  ;;  %p877_p1 = scmp.eq.s32.totalorder %s468_s26, 0 }
  0x12   : > { %p159_p2 = scmp.ne.s32.totalorder %s758_s17, %s754_s16  ;;  %p160_p4 = scmp.eq.s32.totalorder %s468_s26, 3 }
  0x13   : > { %s1119_s28 = scalar_select %p877_p1, 1, 0 }
  0x14   : > { %p886_p3 = por %p877_p1, %p106_p0  ;;  %p165_p5 = scmp.ne.s32.totalorder %s754_s16, %s750_s15 }
  0x15   : > { %p166_p6 = scmp.eq.s32.totalorder %s469_s27, 3  ;;  %p892_p7 = por %p160_p4, %p159_p2 }
  0x16   : > { %s1120_s30 = scalar_select %p886_p3, 1, 0 }
  0x17   : > { %s1121_s5 = scalar_select %p892_p7, 1, 0 }
  0x18   : > { %p470_p8 = scmp.ge.s32.totalorder %s790_s25, 1  ;;  %p897_p9 = por %p166_p6, %p165_p5 }
  0x19   : > { %1122 = sst [smem:[#allocation14_spill]] %s1121_s5  ;;  %p173_p10 = scmp.lt.s32.totalorder %s790_s25, 5 }
  0x1a   : > { %s1123_s6 = scalar_select %p897_p9, 1, 0 }
  0x1b   : > { %p902_p11 = pnand %p470_p8, %p173_p10  ;;  %s792_s8 = smov [#allocation3]  }
  0x1c   : > { %1124 = sst [smem:[#allocation15_spill]] %s1123_s6  ;;  %s186_s9 = sshll.u32 %s792_s8, 4  ;;  %s187_s9 = int_to_ptr.vmem [resolvable:$true] %s186_s9 }
  0x1d   : > { %s1125_s7 = scalar_select %p902_p11, 1, 0 }
  0x1e   : > { %p500_p12 = pneg %p902_p11  ;;  %s36_s11 = sadd.s32 1, %s782_s23 }
  0x1f   : > { %s1127_s0 = sld [smem:[#allocation17_spill]] }
  0x20   : > { %p910_p13 = pnand %p500_p12, %p877_p1 }
  0x22   : > { %p608_p2 = pneg %p910_p13 }
  0x25   : > { %s606_s14 = scalar_lea.hbm %s1127_s0, 32 }
  0x26   : > { %p607_p0 = scmp.ne.s32.totalorder %s1127_s0, %s606_s14  ;;  %p613_p6 = scmp.lt.u32.totalorder %s606_s14, %s1127_s0 }
  0x28   : > { %p609_p4 = pnand %p608_p2, %p607_p0 }
  0x2a   : > { %p610_p5 = pneg %p609_p4 }
  0x2c   : > { %p615_p8 = pnand %p613_p6, %p610_p5 }
  0x2e   : > { %618 = shalt.err (!%p615_p8)
}
  0x2f   : > { %s619_s29 = scalar_lea.vmem %s187_s9, 32  ;;  %p627_p7 = scmp.lt.s32.totalorder %s187_s9, %s187_s9 }
  0x30   : > { %p620_p10 = scmp.ne.s32.totalorder %s187_s9, %s619_s29  ;;  %p628_p3 = scmp.lt.s32.totalorder %s619_s29, %s619_s29 }
  0x32   : > { %p622_p12 = pnand %p620_p10, %p608_p2  ;;  %p629_p1 = por %p628_p3, %p627_p7 }
  0x34   : > { %p623_p9 = pneg %p622_p12 }
  0x36   : > { %p630_p11 = pnand %p629_p1, %p623_p9 }
  0x38   : > { %633 = shalt.err (!%p630_p11)
}
  0x39   : > { %503 = dma.hbm_to_vmem [thread:$0]  (!%p910_p13), %s1127_s0, 32, %s187_s9, [#allocation4]  }
  0x3a   : > { %p38_p0 = scmp.ge.s32.totalorder %s36_s11, 2  ;;  %s40_s29 = sadd.s32 1, %s786_s24 }
  0x3b   : > { %s93_s14 = sadd.s32 1, %s770_s20  ;;  %p100_p1 = scmp.ne.s32.totalorder %s770_s20, %s766_s19 }
  0x3c   : > { %s1157_s11 = smov (%p38_p0, %s36_s11), 0  ;;  %s1159_s29 = smov (!%p38_p0, %s40_s29), %s786_s24 }
  0x3d   : > { %1128 = sst [smem:[#allocation16_spill]] %s1157_s11  ;;  %s86_s10 = ssub.s32 %s782_s23, %s1157_s11 }
  0x3e   : > { %p101_p3 = scmp.eq.s32.totalorder %s790_s25, 0  ;;  %p42_p7 = scmp.ge.s32.totalorder %s1159_s29, 2 }
  0x3f   : > { %p513_p9 = scmp.lt.s32.totalorder %s790_s25, 4  ;;  %s200_s9 = sand.u32 1, %s770_s20  }
  0x40   : > { %p942_p11 = por %p101_p3, %p100_p1  ;;  %s1161_s29 = smov (%p42_p7, %s1159_s29), 0 }
  0x41   : > { %s473_s26 = sshll.u32 %s200_s9, 1  ;;  %s87_s27 = ssub.s32 %s786_s24, %s1161_s29 }
  0x42   : > { %s88_s8 = sor.u32 %s87_s27, %s86_s10  ;;  %p147_p13 = scmp.eq.s32.totalorder %s87_s27, 0 }
  0x43   : > { %p91_p2 = scmp.eq.s32.totalorder %s88_s8, 0  ;;  %s474_s12 = sshll.u32 %s782_s23, 1 }
  0x44   : > { %s1130_s13 = sadd.s32 1, %s758_s17  ;;  %s210_s6 = sadd.s32 %s786_s24, %s474_s12 }
  0x45   : > { %s955_s0 = scalar_select %p147_p13, %s758_s17, %s1130_s13  }
  0x46   : > { %s958_s11 = scalar_select %p91_p2, %s770_s20, %s93_s14  }
  0x47   : > { %s204_s15 = scalar_lea.vmem [#allocation6], %s473_s26  ;;  %s475_s5 = sshll.u32 %s210_s6, 5 }
  0x48   : > { %s214_s4 = sshll.u32 %s204_s15, 4  ;;  %s966_s22 = scalar_lea.hbm %s1098_s2, %s475_s5  ;;  %s961_s4 = int_to_ptr.vmem [resolvable:$true] %s214_s4 }
  0x49   : > { %p972_p4 = pnand %p513_p9, %p942_p11  ;;  %s201_s15 = scalar_lea.sflag [#allocation7], %s200_s9 }
  0x4a   : > { %s634_s6 = scalar_lea.hbm %s966_s22, 32  ;;  %s639_s5 = scalar_lea.hbm %s1098_s2, 128 }
  0x4b   : > { %p635_p5 = scmp.ne.s32.totalorder %s966_s22, %s634_s6  ;;  %p636_p6 = pneg %p972_p4 }
  0x4c   : > { %p640_p12 = scmp.lt.u32.totalorder %s966_s22, %s1098_s2  ;;  %p641_p0 = scmp.lt.u32.totalorder %s639_s5, %s634_s6 }
  0x4d   : > { %p637_p8 = pnand %p636_p6, %p635_p5  ;;  %p643_p3 = scmp.lt.u32.totalorder %s634_s6, %s966_s22 }
  0x4e   : > { %p642_p1 = por %p641_p0, %p640_p12 }
  0x4f   : > { %p638_p10 = pneg %p637_p8 }
  0x50   : > { %p644_p7 = por %p643_p3, %p642_p1 }
  0x52   : > { %p645_p9 = pnand %p644_p7, %p638_p10 }
  0x54   : > { %648 = shalt.err (!%p645_p9)
}
  0x55   : > { %s649_s9 = scalar_lea.vmem %s961_s4, 32  ;;  %s793_s26 = smov [#allocation6]  }
  0x56   : > { %p650_p11 = scmp.ne.s32.totalorder %s961_s4, %s649_s9  ;;  %s654_s27 = sshll.u32 %s793_s26, 4  ;;  %s655_s27 = int_to_ptr.vmem [resolvable:$false] %s654_s27 }
  0x57   : > { %s656_s8 = scalar_lea.vmem %s655_s27, 64  ;;  %p657_p5 = scmp.lt.s32.totalorder %s961_s4, %s655_s27 }
  0x58   : > { %p652_p13 = pnand %p650_p11, %p636_p6  ;;  %p658_p8 = scmp.lt.s32.totalorder %s656_s8, %s649_s9 }
  0x5a   : > { %p653_p2 = pneg %p652_p13  ;;  %p659_p12 = por %p658_p8, %p657_p5 }
  0x5c   : > { %p660_p0 = pnand %p659_p12, %p653_p2 }
  0x5e   : > { %663 = shalt.err (!%p660_p0)
}
  0x5f   : > { %507 = dma.hbm_to_vmem [thread:$0]  (!%p972_p4), %s966_s22, 32, %s961_s4, %s201_s15  }
  0x60   : > { %p1132_p10 = scmp.ne.s32.totalorder %s1125_s7, 0 }
  0x61   : > { %p1133_p6 = scmp.ne.s32.totalorder (!%p1132_p10), %s1119_s28, 0 }
  0x62   : > { %237 = sbr.rel (%p1132_p10) target bundleno = 377 (0x179), region = 36 }
  0x69   : > { %737 = dma.done.wait (%p1133_p6), [#allocation4], 32  }
  0x6a   : > { %739 = vsyncadd (%p1133_p6), [#allocation4], 4294967264  ;;  %s243_s12 = sand.u32 1, %s766_s19   ;;  %p1134_p1 = scmp.ne.s32.totalorder %s1120_s30, 0 }
  0x6b   : > { %s478_s13 = sshll.u32 %s243_s12, 1  ;;  %s244_s6 = scalar_lea.sflag [#allocation7], %s243_s12 }
  0x6c   : > { %s247_s1 = scalar_lea.vmem [#allocation6], %s478_s13 }
  0x6d   : > { %741 = dma.done.wait (%p1134_p1), %s244_s6, 32  }
  0x6e   : > { %743 = vsyncadd (%p1134_p1), %s244_s6, 4294967264  ;;  %s1135_s4 = sld [smem:[#allocation13_spill]]  ;;  %s280_s22 = sand.u32 1, %s754_s16  }
  0x6f   : > { %p283_p4 = scmp.lt.s32.totalorder %s774_s21, 1  ;;  %s1016_s28 = sshll.u32 %s280_s22, 3 }
  0x70   : > { %p294_p7 = scmp.eq.s32.totalorder %s774_s21, 0  ;;  %s1136_s10 = sld [smem:[#allocation19_spill]] }
  0x71   : > { %s284_s7 = scalar_select %p283_p4, %s774_s21, 1 }
  0x72   : > { %s282_s9 = scalar_lea.vmem [#allocation8], %s1016_s28  ;;  %v794_v0 = vmov (%p294_p7), 0.0  }
  0x73   : > { %s480_s14 = sshll.u32 %s284_s7, 1  ;;  %299 = sbr.rel (!%p294_p7) target bundleno = 122 (0x7a), region = 48  ;;  %300 = vst [vmem:[#allocation2] sm:$0x3] (%p294_p7), %v794_v0 }
  0x74   : > { %p285_p3 = scmp.lt.s32.totalorder %s1135_s4, 1 }
  0x76   : > { %s1163_s4 = smov (!%p285_p3, %s1135_s4), 1 }
  0x77   : > { %s291_s30 = sadd.s32 %s480_s14, %s1163_s4 }
  0x78   : > { %s481_s15 = sshll.u32 %s291_s30, 1 }
  0x79   : > { %s293_s18 = scalar_lea.vmem %s1136_s10, %s481_s15 }
  0x7a PF: > { %v301_v1 = vld [vmem:[%s247_s1] sm:$0x3]  ;;  %v302_v2 = vld [vmem:[%s293_s18] sm:$0x3]  ;;  %p314_p9 = scmp.eq.s32.totalorder %s774_s21, 1  ;;  %s1137_s8 = sld [smem:[#allocation18_spill]] }
  0x7b   : > { %v303_v3 = vsub.f32 %v301_v1, %v302_v2  ;;  %v304_v4 = vld [vmem:[#allocation3] sm:$0x3]  ;;  %v306_v10 = vld [vmem:[#allocation2] sm:$0x3]  ;;  %vm320_vm0 = vcmask (%p314_p9), 1041408  }
  0x7d   : > { %v307_v6 = vmul.f32 %v303_v3, %v303_v3  ;;  %v309_v7 = vand.u32 2147483647, %v303_v3 }
  0x7f   : > { %v308_v8 = vmul.f32 %v307_v6, %v304_v4 }
  0x80   : > { %v305_v5 = vld [vmem:[%s1137_s8] sm:$0x3] }
  0x81   : > { %v310_v9 = vmul.f32 %v309_v7, %v305_v5  ;;  %318 = sbr.rel (!%p314_p9) target bundleno = 350 (0x15e), region = 52 }
  0x83   : > { %v311_v11 = vadd.f32 %v310_v9, %v308_v8 }
  0x85   : > { %v312_v12 = vadd.f32 %v311_v11, %v306_v10 }
  0x87   : > { %313 = vst [vmem:[#allocation2] sm:$0x3] %v312_v12 }
  0x8e   : > { %v319_v13 = vld [vmem:[#allocation2] sm:$0x3] }
  0x8f   : > { %v321_v14 = vsel %vm320_vm0, %v319_v13, 0.0 }
  0x90   : > { %322 = vadd.xlane.f32.xlu0 %v321_v14 }
 0x11d   : > { %v323_v15 = vpop.xlane.xlu0 %322 }
 0x11e   : > { %v324_v16 = vrot.slane %v323_v15, 4 }
 0x120   : > { %v325_v17 = vadd.f32 %v324_v16, %v323_v15 }
 0x122   : > { %v326_v18 = vrot.slane %v325_v17, 2 }
 0x124   : > { %v327_v19 = vadd.f32 %v326_v18, %v325_v17 }
 0x126   : > { %v328_v20 = vrot.slane %v327_v19, 1 }
 0x128   : > { %v329_v21 = vadd.f32 %v328_v20, %v327_v19 }
 0x12a   : > { %490 = vpush %v329_v21 }
 0x15b   : > { %s491_s21 = spop %490 }
 0x15c   : > { %v331_v22 = vstv %s491_s21 }
 0x15d   : > { %333 = vst [vmem:[%s282_s9] sm:$0xff] %v331_v22 }
 0x15e PF: > { %s1138_s12 = sld [smem:[#allocation13_spill]]  ;;  %s1139_s13 = sld [smem:[#allocation14_spill]] }
 0x15f   : > { %s1140_s7 = sld [smem:[#allocation20_spill]]  ;;  %s348_s30 = sshll.u32 %s282_s9, 4  ;;  %s349_s30 = int_to_ptr.vmem [resolvable:$true] %s348_s30 }
 0x160   : > { %s335_s15 = scalar_lea.sflag [#allocation5], %s280_s22  ;;  %s664_s3 = scalar_lea.vmem %s349_s30, 128 }
 0x161   : > { %p665_p11 = scmp.ne.s32.totalorder %s349_s30, %s664_s3  ;;  %s795_s5 = smov [#allocation8]  }
 0x162   : > { %s668_s10 = sshll.u32 %s795_s5, 4  ;;  %s669_s10 = int_to_ptr.vmem [resolvable:$false] %s668_s10 }
 0x163   : > { %s670_s18 = scalar_lea.vmem %s669_s10, 256  ;;  %p671_p8 = scmp.lt.s32.totalorder %s349_s30, %s669_s10 }
 0x164   : > { %s485_s6 = sshll.u32 %s1138_s12, 7  ;;  %p1141_p13 = scmp.ne.s32.totalorder %s1139_s13, 0 }
 0x165   : > { %s1036_s14 = scalar_lea.hbm %s1140_s7, %s485_s6  ;;  %p672_p12 = scmp.lt.s32.totalorder %s670_s18, %s664_s3 }
 0x166   : > { %p666_p2 = pnand %p665_p11, %p1141_p13 }
 0x167   : > { %p673_p0 = por %p672_p12, %p671_p8 }
 0x168   : > { %p667_p5 = pneg %p666_p2 }
 0x16a   : > { %p674_p10 = pnand %p673_p0, %p667_p5 }
 0x16c   : > { %677 = shalt.err (!%p674_p10)
}
 0x16d   : > { %s678_s22 = scalar_lea.hbm %s1036_s14, 128  ;;  %s682_s26 = scalar_lea.hbm %s1140_s7, 256 }
 0x16e   : > { %p679_p6 = scmp.ne.s32.totalorder %s1036_s14, %s678_s22  ;;  %p683_p3 = scmp.lt.u32.totalorder %s1036_s14, %s1140_s7 }
 0x16f   : > { %p684_p7 = scmp.lt.u32.totalorder %s682_s26, %s678_s22  ;;  %p686_p11 = scmp.lt.u32.totalorder %s678_s22, %s1036_s14 }
 0x170   : > { %p680_p1 = pnand %p679_p6, %p1141_p13 }
 0x171   : > { %p685_p9 = por %p684_p7, %p683_p3 }
 0x172   : > { %p681_p4 = pneg %p680_p1 }
 0x173   : > { %p687_p2 = por %p686_p11, %p685_p9 }
 0x175   : > { %p688_p5 = pnand %p687_p2, %p681_p4 }
 0x177   : > { %691 = shalt.err (!%p688_p5)
}
 0x178   : > { %498 = dma.vmem_to_hbm [thread:$0]  (%p1141_p13), %s349_s30, 128, %s1036_s14, %s335_s15  }
 0x179 PF: > { %s1142_s21 = sld [smem:[#allocation12_spill]]  ;;  %s1143_s12 = sld [smem:[#allocation15_spill]] }
 0x17a   : > { %p515_p8 = scmp.ge.s32.totalorder %s790_s25, 2 }
 0x17f   : > { %s360_s6 = sand.u32 1, %s1142_s21   ;;  %p1144_p12 = scmp.ne.s32.totalorder %s1143_s12, 0 }
 0x180   : > { %s361_s1 = scalar_lea.sflag [#allocation5], %s360_s6 }
 0x181   : > { %p509_p0 = pnand %p515_p8, %p1144_p12 }
 0x183   : > { %745 = dma.done.wait (!%p509_p0), %s361_s1, 128  }
 0x184   : > { %747 = vsyncadd (!%p509_p0), %s361_s1, 4294967168  ;;  %s21_s25 = sadd.s32 1, %s790_s25   ;;  %s1145_s13 = sld [smem:[#allocation16_spill]] }
 0x185   : > { %p18_p10 = scmp.ge.s32.totalorder %s21_s25, 6   ;;  %s1146_s15 = smov %s754_s16 }
 0x186   : > { %s1147_s16 = smov %s758_s17  ;;  %s1148_s17 = smov %s955_s0 }
 0x187   : > { %s1149_s18 = smov %s766_s19  ;;  %s1150_s19 = smov %s770_s20 }
 0x188   : > { %s1151_s20 = smov %s958_s11  ;;  %s1152_s21 = smov %s782_s23 }
 0x189   : > { %s1153_s22 = smov %s786_s24  ;;  %s1155_s24 = smov %s1161_s29 }
 0x18a   : > { %s1154_s23 = smov %s1145_s13  ;;  %20 = sbr.rel (!%p18_p10) target bundleno = 15 (0xf), region = 97 }
 0x191   :  { %366 = vsyncpa [#allocation4], 1 }
 0x192   :  { %368 = vsyncpa [#allocation4 + $0x1], 1 }
 0x193   :  { %369 = vsyncpa [#allocation7], 1 }
 0x194   :  { %371 = vsyncpa [#allocation7 + $0x1], 1 }
 0x195   :  { %372 = vsyncpa [#allocation5], 1 }
 0x196   :  { %374 = vsyncpa [#allocation5 + $0x1], 1 }

</bundles_post_ra>
